<compile_context>
chip_gen: v7x
topology: tpu7x:2x2x1
jax: 0.10.0
libtpu: 0.0.40
codegen_flags: <defaults>
</compile_context>

<pallas_src>
import math
from functools import partial

import numpy as np

import jax
import jax.numpy as jnp
from jax import lax
from jax.experimental import pallas as pl
from jax.experimental.pallas import tpu as pltpu


def _round_up(v, m):
    return ((v + m - 1) // m) * m


def _vmem_limits():
    """(vmem_limit_bytes, per-step block budget).  Default is v7x-safe (64 MiB VMEM per
    TensorCore -> 48 MiB scoped limit, ~24 MiB for blocks+scratch); raised on 128-MiB
    v5e/v6e parts so bands can grow further."""
    vmem_limit = 48 * 1024 * 1024
    try:
        cap = int(pltpu.get_tpu_info().vmem_capacity_bytes)
        if cap >= 128 * 1024 * 1024:          # v5e / v6e
            vmem_limit = 96 * 1024 * 1024
    except Exception:
        pass
    return vmem_limit, vmem_limit // 2


def _pick_tile_h(h, n_batch, pitch, cin, cout_t, kkc, pad, block_budget):
    """Row-band height: whole image when it fits (and gives enough grid steps),
    otherwise the largest 128-lane-aligned band that fits the VMEM block budget."""
    g = 128 // math.gcd(pitch, 128)   # tile_h granularity for 128-aligned band offsets

    def fits(th):
        nb = -(-h // th)
        rows_pad = nb * th + 2 * pad
        q = th * pitch
        l_band = _round_up((th + 2 * pad) * pitch, 128)
        l_in = max(rows_pad * pitch, (nb - 1) * th * pitch + l_band)
        need = 4 * (2 * cin * l_in        # resident input block (double-buffered)
                    + 2 * cout_t * q      # output block (double-buffered)
                    + kkc * q             # im2col VMEM scratch
                    + cout_t * q          # f32 matmul / epilogue temporary
                    + 3 * cin * l_band)   # roll / slice temporaries
        return need <= block_budget

    want_bands = max(1, -(-4 // max(n_batch, 1)))     # aim for >=4 parallel grid steps
    if h <= 2 * g or (want_bands == 1 and fits(h)):
        # Tiny image (banding would force >=g rows of zero padding) or whole image fits.
        # TODO(synk): fall back to halo'd per-band input DMA if a tight-pitch image ever
        # gets so tall that the whole padded image exceeds the VMEM budget.
        return h
    th = min(_round_up(-(-h // want_bands), g), _round_up(h, g))
    th = max(g, (th // g) * g)
    while th > g and not fits(th):
        th = max(g, ((th // 2) // g) * g)
    return th


def _conv_band_kernel(x_ref, w_ref, b_ref, a_ref, o_ref, rhs_ref, *,
                      ksize, pitch, tile_h, l_band, n_bands):
    """One output row-band: build the (K*K*Cin, Q) patch matrix in VMEM, one fused MXU
    dot, bias + PReLU epilogue, lane-dense store.

    x_ref  : (1, Cin, L_in)      zero-padded, row-flattened image (resident per batch)
    w_ref  : (Cout_t, K*K*Cin)   fused conv weights (resident)
    b_ref  : (Cout_t, 1)         conv bias, broadcast along lanes
    a_ref  : (1, 1)              PReLU slope (SMEM scalar)
    o_ref  : (1, Cout_t, Q)      Q = tile_h * pitch, band-contiguous in the output
    rhs_ref: (K*K*Cin, Q)        VMEM scratch: im2col patch matrix for the fused dot
    """
    cin = x_ref.shape[1]
    q = o_ref.shape[-1]

    # Halo'd band window.  The wrapper guarantees l_band >= (tile_h + K - 1) * pitch, so
    # rolled wrap-around junk never reaches a valid output lane.
    if n_bands == 1:
        x_band = x_ref[0, :, :l_band]                                  # static, full view
    else:
        start = pl.multiple_of(pl.program_id(1) * (tile_h * pitch), 128)
        x_band = x_ref[0, :, pl.ds(start, l_band)]                     # aligned dyn. slice

    if pitch % 128 == 0:
        # 128-aligned rows: only K-1 lane rolls (one per kw); row offsets (kh) are free
        # aligned lane slices.
        for kw in range(ksize):
            xk = x_band if kw == 0 else pltpu.roll(x_band, shift=l_band - kw, axis=1)
            for kh in range(ksize):
                t = kh * ksize + kw
                rhs_ref[t * cin:(t + 1) * cin, :] = xk[:, kh * pitch: kh * pitch + q]
    else:
        # Tight rows (small W, no lane waste): one roll per tap.
        for kh in range(ksize):
            for kw in range(ksize):
                off = kh * pitch + kw
                t = kh * ksize + kw
                xs = x_band if off == 0 else pltpu.roll(x_band, shift=l_band - off, axis=1)
                rhs_ref[t * cin:(t + 1) * cin, :] = xs[:, :q]

    # Single fused contraction over all K*K*Cin taps (MXU), then bias + PReLU epilogue.
    acc = jnp.dot(w_ref[...], rhs_ref[...], preferred_element_type=jnp.float32)
    acc = acc + b_ref[...]
    alpha = a_ref[0, 0]
    o_ref[0] = jnp.where(acc >= 0.0, acc, alpha * acc).astype(o_ref.dtype)


def shuf_conv_layer2(x_nchw, w_oihw, bias, alpha, *, scaling_factor=2):
    """Pallas implementation of ShufConvLayer2.forward (conv -> pixel_shuffle -> PReLU)."""
    n, cin, h, w = x_nchw.shape
    cout_t, wcin, k, k2 = w_oihw.shape
    assert k == k2 and wcin == cin
    r = scaling_factor
    cout = cout_t // (r * r)
    pad = k // 2
    wp = w + 2 * pad
    kkc = k * k * cin

    # Row pitch: round rows to 128 lanes when the waste is <=12.5% (kh offsets become
    # aligned slices, rolls drop to K-1); otherwise keep the tight pitch (small W).
    wp128 = _round_up(wp, 128)
    pitch = wp128 if wp128 * 8 <= wp * 9 else wp

    vmem_limit, block_budget = _vmem_limits()
    tile_h = _pick_tile_h(h, n, pitch, cin, cout_t, kkc, pad, block_budget)
    n_bands = -(-h // tile_h)

    rows_pad = n_bands * tile_h + 2 * pad
    q = tile_h * pitch
    l_band = _round_up((tile_h + 2 * pad) * pitch, 128)
    l_in = max(rows_pad * pitch, (n_bands - 1) * tile_h * pitch + l_band)
    # Correctness guards: band starts must be 128-lane aligned (multi-band case) and the
    # halo'd window must cover every tap so roll wrap-around stays out of valid lanes.
    assert n_bands == 1 or (tile_h * pitch) % 128 == 0
    assert l_band >= (tile_h + 2 * pad) * pitch
    assert (n_bands - 1) * tile_h * pitch + l_band <= l_in

    # SAME zero pad + row-flatten onto the lane axis (one pad pass; NO per-band stack).
    xp = jnp.pad(x_nchw, ((0, 0), (0, 0),
                          (pad, rows_pad - h - pad),
                          (pad, pitch - w - pad)))
    x_flat = xp.reshape(n, cin, rows_pad * pitch)
    if l_in > rows_pad * pitch:
        x_flat = jnp.pad(x_flat, ((0, 0), (0, 0), (0, l_in - rows_pad * pitch)))

    # Weights fused into a single (Cout_t, K*K*Cin) matrix; row order matches the rhs
    # scratch layout: column index = (kh*K + kw)*Cin + ci.
    w_mat = jnp.transpose(w_oihw, (0, 2, 3, 1)).reshape(cout_t, kkc).astype(x_nchw.dtype)
    bias2 = bias.reshape(cout_t, 1).astype(jnp.float32)
    alpha2 = jnp.reshape(alpha, (1, 1)).astype(jnp.float32)

    kernel = partial(_conv_band_kernel, ksize=k, pitch=pitch, tile_h=tile_h,
                     l_band=l_band, n_bands=n_bands)
    out = pl.pallas_call(
        kernel,
        out_shape=jax.ShapeDtypeStruct((n, cout_t, n_bands * q), x_nchw.dtype),
        grid_spec=pltpu.PrefetchScalarGridSpec(
            num_scalar_prefetch=0,
            grid=(n, n_bands),
            in_specs=[
                pl.BlockSpec((1, cin, l_in), lambda i, b: (i, 0, 0)),   # resident / batch
                pl.BlockSpec((cout_t, kkc), lambda i, b: (0, 0)),       # resident weights
                pl.BlockSpec((cout_t, 1), lambda i, b: (0, 0)),         # bias
                pl.BlockSpec(memory_space=pltpu.MemorySpace.SMEM),      # PReLU slope
            ],
            out_specs=pl.BlockSpec((1, cout_t, q), lambda i, b: (i, 0, b)),
            scratch_shapes=[pltpu.VMEM((kkc, q), x_nchw.dtype)],
        ),
        compiler_params=pltpu.CompilerParams(
            dimension_semantics=("parallel", "parallel"),
            vmem_limit_bytes=vmem_limit,
        ),
    )(x_flat, w_mat, bias2, alpha2)

    # Free reshape (bands are contiguous rows) + crop; the pixel shuffle is the only
    # remaining layout pass.  PReLU was applied in-kernel (single shared slope commutes
    # with the channel->spatial shuffle).
    y = out.reshape(n, cout_t, n_bands * tile_h, pitch)[:, :, :h, :w]
    y = y.reshape(n, cout, r, r, h, w).transpose(0, 1, 4, 2, 5, 3)
    return y.reshape(n, cout, h * r, w * r)


def reference(x_nchw, w_oihw, bias, alpha, r):
    """Pure-JAX reference: Conv2d(bias, SAME) -> PixelShuffle(r) -> PReLU."""
    y = lax.conv_general_dilated(
        x_nchw, w_oihw, (1, 1), "SAME",
        dimension_numbers=("NCHW", "OIHW", "NCHW"),
    )
    y = y + bias.reshape(1, -1, 1, 1)
    n, ct, h, w = y.shape
    c = ct // (r * r)
    y = y.reshape(n, c, r, r, h, w).transpose(0, 1, 4, 2, 5, 3).reshape(n, c, h * r, w * r)
    return jnp.maximum(y, 0.0) + alpha * jnp.minimum(y, 0.0)


if __name__ == "__main__":
    # ShufConvLayer2(in_channels=4, out_channels=4, kernel_size=3, scaling_factor=2)
    n, cin, h, w = 2, 4, 16, 16
    cout, r, k = 4, 2, 3
    ct = cout * r * r                        # conv produces out_channels * r^2 channels

    key = jax.random.PRNGKey(0)
    k1, k2, k3 = jax.random.split(key, 3)
    x = jax.random.normal(k1, (n, cin, h, w), jnp.float32)
    wgt = jax.random.normal(k2, (ct, cin, k, k), jnp.float32) * (1.0 / (cin * k * k) ** 0.5)
    b = jax.random.normal(k3, (ct,), jnp.float32) * 0.1
    alpha = jnp.array(0.25, jnp.float32)     # nn.PReLU() default init

    out = shuf_conv_layer2(x, wgt, b, alpha, scaling_factor=r)
    out = jax.block_until_ready(out)

    ref = reference(x, wgt, b, alpha, r)
    np.testing.assert_allclose(np.asarray(out), np.asarray(ref), rtol=1e-4, atol=1e-4)
    print("KERNEL_OK")
</pallas_src>

<mosaic_0001>
module attributes {stable_mosaic.version = 11 : i64} {
  func.func @_conv_band_kernel(%arg0: i32, %arg1: i32, %arg2: memref<1x4x384xf32, #tpu.memory_space<vmem>>, %arg3: memref<16x36xf32, #tpu.memory_space<vmem>>, %arg4: memref<16x1xf32, #tpu.memory_space<vmem>>, %arg5: memref<1x1xf32, #tpu.memory_space<smem>>, %arg6: memref<1x16x288xf32, #tpu.memory_space<vmem>>, %arg7: memref<36x288xf32, #tpu.memory_space<vmem>>) attributes {dimension_semantics = [#tpu.dimension_semantics<parallel>, #tpu.dimension_semantics<parallel>], iteration_bounds = array<i64: 2, 1>, scalar_prefetch = 0 : i64, scratch_operands = 1 : i64, tpu.core_type = #tpu.core_type<tc>, window_params = [{transform_indices = @transform_0, window_bounds = array<i64: 1, 4, 384>}, {pipeline_mode = #tpu.pipeline_mode<synchronous>, transform_indices = @transform_1, window_bounds = array<i64: 16, 36>}, {pipeline_mode = #tpu.pipeline_mode<synchronous>, transform_indices = @transform_2, window_bounds = array<i64: 16, 1>}, {transform_indices = @transform_3, window_bounds = array<i64: 1, 1>}, {transform_indices = @transform_4, window_bounds = array<i64: 1, 16, 288>}]} {
    %c0 = arith.constant 0 : index
    %c0_0 = arith.constant 0 : index
    %c0_1 = arith.constant 0 : index
    %0 = vector.load %arg2[%c0, %c0_0, %c0_1] : memref<1x4x384xf32, #tpu.memory_space<vmem>>, vector<1x4x384xf32>
    %1 = vector.shape_cast %0 : vector<1x4x384xf32> to vector<4x384xf32>
    %2 = vector.extract_strided_slice %1 {offsets = [0, 0], sizes = [4, 288], strides = [1, 1]} : vector<4x384xf32> to vector<4x288xf32>
    %c0_2 = arith.constant 0 : index
    %c0_3 = arith.constant 0 : index
    %3 = vector.load %arg7[%c0_2, %c0_3] : memref<36x288xf32, #tpu.memory_space<vmem>>, vector<4x288xf32>
    tpu.vector_store %arg7[%c0_2, %c0_3], %2 {strides = array<i32>} : memref<36x288xf32, #tpu.memory_space<vmem>>, vector<4x288xf32>,
    %c383_i32 = arith.constant 383 : i32
    %4 = tpu.dynamic_rotate %1 by %c383_i32 dim 1 : vector<4x384xf32>, i32 -> vector<4x384xf32>
    %5 = vector.extract_strided_slice %4 {offsets = [0, 0], sizes = [4, 288], strides = [1, 1]} : vector<4x384xf32> to vector<4x288xf32>
    %c4 = arith.constant 4 : index
    %c0_4 = arith.constant 0 : index
    %6 = vector.load %arg7[%c4, %c0_4] : memref<36x288xf32, #tpu.memory_space<vmem>>, vector<4x288xf32>
    tpu.vector_store %arg7[%c4, %c0_4], %5 {strides = array<i32>} : memref<36x288xf32, #tpu.memory_space<vmem>>, vector<4x288xf32>,
    %c382_i32 = arith.constant 382 : i32
    %7 = tpu.dynamic_rotate %1 by %c382_i32 dim 1 : vector<4x384xf32>, i32 -> vector<4x384xf32>
    %8 = vector.extract_strided_slice %7 {offsets = [0, 0], sizes = [4, 288], strides = [1, 1]} : vector<4x384xf32> to vector<4x288xf32>
    %c8 = arith.constant 8 : index
    %c0_5 = arith.constant 0 : index
    %9 = vector.load %arg7[%c8, %c0_5] : memref<36x288xf32, #tpu.memory_space<vmem>>, vector<4x288xf32>
    tpu.vector_store %arg7[%c8, %c0_5], %8 {strides = array<i32>} : memref<36x288xf32, #tpu.memory_space<vmem>>, vector<4x288xf32>,
    %c366_i32 = arith.constant 366 : i32
    %10 = tpu.dynamic_rotate %1 by %c366_i32 dim 1 : vector<4x384xf32>, i32 -> vector<4x384xf32>
    %11 = vector.extract_strided_slice %10 {offsets = [0, 0], sizes = [4, 288], strides = [1, 1]} : vector<4x384xf32> to vector<4x288xf32>
    %c12 = arith.constant 12 : index
    %c0_6 = arith.constant 0 : index
    %12 = vector.load %arg7[%c12, %c0_6] : memref<36x288xf32, #tpu.memory_space<vmem>>, vector<4x288xf32>
    tpu.vector_store %arg7[%c12, %c0_6], %11 {strides = array<i32>} : memref<36x288xf32, #tpu.memory_space<vmem>>, vector<4x288xf32>,
    %c365_i32 = arith.constant 365 : i32
    %13 = tpu.dynamic_rotate %1 by %c365_i32 dim 1 : vector<4x384xf32>, i32 -> vector<4x384xf32>
    %14 = vector.extract_strided_slice %13 {offsets = [0, 0], sizes = [4, 288], strides = [1, 1]} : vector<4x384xf32> to vector<4x288xf32>
    %c16 = arith.constant 16 : index
    %c0_7 = arith.constant 0 : index
    %15 = vector.load %arg7[%c16, %c0_7] : memref<36x288xf32, #tpu.memory_space<vmem>>, vector<4x288xf32>
    tpu.vector_store %arg7[%c16, %c0_7], %14 {strides = array<i32>} : memref<36x288xf32, #tpu.memory_space<vmem>>, vector<4x288xf32>,
    %c364_i32 = arith.constant 364 : i32
    %16 = tpu.dynamic_rotate %1 by %c364_i32 dim 1 : vector<4x384xf32>, i32 -> vector<4x384xf32>
    %17 = vector.extract_strided_slice %16 {offsets = [0, 0], sizes = [4, 288], strides = [1, 1]} : vector<4x384xf32> to vector<4x288xf32>
    %c20 = arith.constant 20 : index
    %c0_8 = arith.constant 0 : index
    %18 = vector.load %arg7[%c20, %c0_8] : memref<36x288xf32, #tpu.memory_space<vmem>>, vector<4x288xf32>
    tpu.vector_store %arg7[%c20, %c0_8], %17 {strides = array<i32>} : memref<36x288xf32, #tpu.memory_space<vmem>>, vector<4x288xf32>,
    %c348_i32 = arith.constant 348 : i32
    %19 = tpu.dynamic_rotate %1 by %c348_i32 dim 1 : vector<4x384xf32>, i32 -> vector<4x384xf32>
    %20 = vector.extract_strided_slice %19 {offsets = [0, 0], sizes = [4, 288], strides = [1, 1]} : vector<4x384xf32> to vector<4x288xf32>
    %c24 = arith.constant 24 : index
    %c0_9 = arith.constant 0 : index
    %21 = vector.load %arg7[%c24, %c0_9] : memref<36x288xf32, #tpu.memory_space<vmem>>, vector<4x288xf32>
    tpu.vector_store %arg7[%c24, %c0_9], %20 {strides = array<i32>} : memref<36x288xf32, #tpu.memory_space<vmem>>, vector<4x288xf32>,
    %c347_i32 = arith.constant 347 : i32
    %22 = tpu.dynamic_rotate %1 by %c347_i32 dim 1 : vector<4x384xf32>, i32 -> vector<4x384xf32>
    %23 = vector.extract_strided_slice %22 {offsets = [0, 0], sizes = [4, 288], strides = [1, 1]} : vector<4x384xf32> to vector<4x288xf32>
    %c28 = arith.constant 28 : index
    %c0_10 = arith.constant 0 : index
    %24 = vector.load %arg7[%c28, %c0_10] : memref<36x288xf32, #tpu.memory_space<vmem>>, vector<4x288xf32>
    tpu.vector_store %arg7[%c28, %c0_10], %23 {strides = array<i32>} : memref<36x288xf32, #tpu.memory_space<vmem>>, vector<4x288xf32>,
    %c346_i32 = arith.constant 346 : i32
    %25 = tpu.dynamic_rotate %1 by %c346_i32 dim 1 : vector<4x384xf32>, i32 -> vector<4x384xf32>
    %26 = vector.extract_strided_slice %25 {offsets = [0, 0], sizes = [4, 288], strides = [1, 1]} : vector<4x384xf32> to vector<4x288xf32>
    %c32 = arith.constant 32 : index
    %c0_11 = arith.constant 0 : index
    %27 = vector.load %arg7[%c32, %c0_11] : memref<36x288xf32, #tpu.memory_space<vmem>>, vector<4x288xf32>
    tpu.vector_store %arg7[%c32, %c0_11], %26 {strides = array<i32>} : memref<36x288xf32, #tpu.memory_space<vmem>>, vector<4x288xf32>,
    %c0_12 = arith.constant 0 : index
    %c0_13 = arith.constant 0 : index
    %28 = vector.load %arg3[%c0_12, %c0_13] : memref<16x36xf32, #tpu.memory_space<vmem>>, vector<16x36xf32>
    %c0_14 = arith.constant 0 : index
    %c0_15 = arith.constant 0 : index
    %29 = vector.load %arg7[%c0_14, %c0_15] : memref<36x288xf32, #tpu.memory_space<vmem>>, vector<36x288xf32>
    %cst = arith.constant dense<0.000000e+00> : vector<16x288xf32>
    %30 = tpu.matmul %28, %29, %cst {dimension_numbers = #tpu.dot_dimension_numbers<[1], [0], [0], [1], [0, 0, 1, 1], [], []>} : vector<16x36xf32>, vector<36x288xf32>, vector<16x288xf32> -> vector<16x288xf32>
    %c0_16 = arith.constant 0 : index
    %c0_17 = arith.constant 0 : index
    %31 = vector.load %arg4[%c0_16, %c0_17] : memref<16x1xf32, #tpu.memory_space<vmem>>, vector<16x1xf32>
    %32 = vector.broadcast %31 : vector<16x1xf32> to vector<16x288xf32>
    %33 = arith.addf %30, %32 : vector<16x288xf32>
    %c0_18 = arith.constant 0 : index
    %c0_19 = arith.constant 0 : index
    %34 = memref.load %arg5[%c0_18, %c0_19] : memref<1x1xf32, #tpu.memory_space<smem>>
    %cst_20 = arith.constant 0.000000e+00 : f32
    %35 = vector.broadcast %cst_20 : f32 to vector<16x288xf32>
    %36 = arith.cmpf oge, %33, %35 : vector<16x288xf32>
    %37 = vector.broadcast %34 : f32 to vector<16x288xf32>
    %38 = arith.mulf %37, %33 : vector<16x288xf32>
    %39 = arith.select %36, %33, %38 : vector<16x288xi1>, vector<16x288xf32>
    %c0_21 = arith.constant 0 : index
    %c0_22 = arith.constant 0 : index
    %c0_23 = arith.constant 0 : index
    %40 = vector.load %arg6[%c0_21, %c0_22, %c0_23] : memref<1x16x288xf32, #tpu.memory_space<vmem>>, vector<1x16x288xf32>
    %41 = vector.shape_cast %40 : vector<1x16x288xf32> to vector<16x288xf32>
    %42 = vector.shape_cast %39 : vector<16x288xf32> to vector<1x16x288xf32>
    tpu.vector_store %arg6[%c0_21, %c0_22, %c0_23], %42 {strides = array<i32>} : memref<1x16x288xf32, #tpu.memory_space<vmem>>, vector<1x16x288xf32>,
    return
  }
  func.func @transform_0(%arg0: i32, %arg1: i32) -> (i32, i32, i32) {
    %c0_i32 = arith.constant 0 : i32
    %c0_i32_0 = arith.constant 0 : i32
    %c0_i32_1 = arith.constant 0 : i32
    return %arg0, %c0_i32, %c0_i32_0 : i32, i32, i32
  }
  func.func @transform_1(%arg0: i32, %arg1: i32) -> (i32, i32) {
    %c0_i32 = arith.constant 0 : i32
    %c0_i32_0 = arith.constant 0 : i32
    %c0_i32_1 = arith.constant 0 : i32
    return %c0_i32, %c0_i32_0 : i32, i32
  }
  func.func @transform_2(%arg0: i32, %arg1: i32) -> (i32, i32) {
    %c0_i32 = arith.constant 0 : i32
    %c0_i32_0 = arith.constant 0 : i32
    %c0_i32_1 = arith.constant 0 : i32
    return %c0_i32, %c0_i32_0 : i32, i32
  }
  func.func @transform_3(%arg0: i32, %arg1: i32) -> (i32, i32) {
    %c0_i32 = arith.constant 0 : i32
    %c0_i32_0 = arith.constant 0 : i32
    %c0_i32_1 = arith.constant 0 : i32
    return %c0_i32, %c0_i32_0 : i32, i32
  }
  func.func @transform_4(%arg0: i32, %arg1: i32) -> (i32, i32, i32) {
    %c0_i32 = arith.constant 0 : i32
    %c0_i32_0 = arith.constant 0 : i32
    return %arg0, %c0_i32, %arg1 : i32, i32, i32
  }
}

</mosaic_0001>

<bundles_post_ra>
// kernel: tpu_custom_call.1
= control target key start
LH: loop header
LB: loop body
LE: loop exit
PB: predicated region body
PF: predicated region fallthrough
CT: control target
= control target key end

     0   :  { %s1231_s0 = inlined_call_operand.hbm [shape: f32[2,4,384], index: 0, kind: input, shape index: {}]   ;;  %s1232_s1 = inlined_call_operand.vmem [shape: f32[16,36], index: 1, kind: input, shape index: {}]   ;;  %s1233_s2 = inlined_call_operand.vmem [shape: f32[16,1], index: 2, kind: input, shape index: {}]   ;;  %s1234_s3 = inlined_call_operand.<no memory space> [shape: f32[1,1], index: 3, kind: input, shape index: {}]   ;;  %s1235_s4 = inlined_call_operand.hbm [shape: f32[2,16,288], index: 4, kind: output, shape index: {}]  }
   0x1   :  { %9 = sst [smem:[#allocation3]] %s1234_s3 }
   0x2   :  { %10 = vsyncpa [#allocation5], 0 }
   0x3   :  { %12 = vsyncpa [#allocation5 + $0x1], 0 }
   0x4   :  { %13 = vsyncpa [#allocation6], 0 }
   0x5   :  { %15 = vsyncpa [#allocation6 + $0x1], 0  ;;  %s997_s17 = smov 0   ;;  %s999_s18 = smov 0  }
   0x6   :  { %s1001_s19 = smov 0   ;;  %s1003_s20 = smov 0  }
   0x7   :  { %s1005_s21 = smov 0   ;;  %s1007_s22 = smov 0  }
   0x8 LB: > { %s707_s3 = sadd.s32 4294967295, %s953_s22   ;;  %s708_s23 = sadd.s32 4294967294, %s953_s22   ;;  %s953_s22 = sphi %s1007_s22, %s21_s22   ;;  %s949_s21 = sphi %s1005_s21, %s1250_s21   ;;  %s945_s20 = sphi %s1003_s20, %s1249_s20   ;;  %s941_s19 = sphi %s1001_s19, %s1248_s19   ;;  %s937_s18 = sphi %s999_s18, %s1247_s18   ;;  %s933_s17 = sphi %s997_s17, %s1246_s17  }
   0x9   : > { %s33_s24 = sadd.s32 1, %s949_s21  ;;  %s40_s25 = sadd.s32 1, %s941_s19 }
   0xa   : > { %p35_p0 = scmp.ge.s32.totalorder %s33_s24, 2  ;;  %p47_p1 = scmp.ne.s32.totalorder %s941_s19, %s937_s18 }
   0xb   : > { %p48_p2 = scmp.eq.s32.totalorder %s953_s22, 0  ;;  %p53_p3 = scmp.ne.s32.totalorder %s937_s18, %s933_s17 }
   0xc   : > { %s1252_s24 = smov (%p35_p0, %s33_s24), 0  ;;  %p54_p5 = scmp.eq.s32.totalorder %s707_s3, 0 }
   0xd   : > { %p1038_p4 = por %p48_p2, %p47_p1  ;;  %s37_s27 = ssub.s32 %s949_s21, %s1252_s24 }
   0xe   : > { %p142_p6 = scmp.eq.s32.totalorder %s707_s3, 1  ;;  %p38_p7 = scmp.eq.s32.totalorder %s37_s27, 0 }
   0xf   : > { %p1044_p8 = por %p54_p5, %p53_p3  ;;  %p148_p10 = scmp.eq.s32.totalorder %s708_s23, 1 }
  0x10   : > { %p1048_p9 = por %p142_p6, %p47_p1  ;;  %p776_p13 = scmp.lt.s32.totalorder %s953_s22, 2 }
  0x11   : > { %s1053_s30 = scalar_select %p38_p7, %s941_s19, %s40_s25  }
  0x12   : > { %s1239_s29 = scalar_select %p1048_p9, 1, 0 }
  0x13   : > { %p1055_p11 = por %p148_p10, %p53_p3  ;;  %s177_s6 = sand.u32 1, %s941_s19  }
  0x14   : > { %s759_s7 = smul.u32 12, %s177_s6  ;;  %p1065_p0 = pnand %p776_p13, %p1038_p4 }
  0x15   : > { %s1240_s5 = scalar_select %p1055_p11, 1, 0 }
  0x16   : > { %s760_s8 = smul.u32 192, %s949_s21  ;;  %s181_s13 = scalar_lea.vmem [#allocation4], %s759_s7 }
  0x17   : > { %s189_s14 = sshll.u32 %s181_s13, 4  ;;  %s178_s15 = scalar_lea.sflag [#allocation5], %s177_s6  ;;  %s1075_s14 = int_to_ptr.vmem [resolvable:$true] %s189_s14 }
  0x18   : > { %s1073_s12 = scalar_lea.hbm %s1231_s0, %s760_s8  ;;  %p843_p3 = pneg %p1065_p0 }
  0x19   : > { %s841_s16 = scalar_lea.hbm %s1073_s12, 192  ;;  %s846_s25 = scalar_lea.hbm %s1231_s0, 384 }
  0x1a   : > { %p842_p2 = scmp.ne.s32.totalorder %s1073_s12, %s841_s16  ;;  %p847_p6 = scmp.lt.u32.totalorder %s1073_s12, %s1231_s0 }
  0x1b   : > { %p848_p7 = scmp.lt.u32.totalorder %s846_s25, %s841_s16  ;;  %p850_p13 = scmp.lt.u32.totalorder %s841_s16, %s1073_s12 }
  0x1c   : > { %p844_p4 = pnand %p843_p3, %p842_p2 }
  0x1d   : > { %p849_p10 = por %p848_p7, %p847_p6 }
  0x1e   : > { %p845_p5 = pneg %p844_p4 }
  0x1f   : > { %p851_p12 = por %p850_p13, %p849_p10 }
  0x21   : > { %p852_p1 = pnand %p851_p12, %p845_p5 }
  0x23   : > { %855 = shalt.err (!%p852_p1)
}
  0x24   : > { %s856_s6 = scalar_lea.vmem %s1075_s14, 192  ;;  %s955_s7 = smov [#allocation4]  }
  0x25   : > { %p857_p2 = scmp.ne.s32.totalorder %s1075_s14, %s856_s6  ;;  %s861_s8 = sshll.u32 %s955_s7, 4  ;;  %s862_s8 = int_to_ptr.vmem [resolvable:$false] %s861_s8 }
  0x26   : > { %s863_s10 = scalar_lea.vmem %s862_s8, 384  ;;  %p864_p9 = scmp.lt.s32.totalorder %s1075_s14, %s862_s8 }
  0x27   : > { %p859_p4 = pnand %p857_p2, %p843_p3  ;;  %p865_p6 = scmp.lt.s32.totalorder %s863_s10, %s856_s6 }
  0x29   : > { %p860_p11 = pneg %p859_p4  ;;  %p866_p7 = por %p865_p6, %p864_p9 }
  0x2b   : > { %p867_p10 = pnand %p866_p7, %p860_p11 }
  0x2d   : > { %870 = shalt.err (!%p867_p10)
}
  0x2e   : > { %771 = dma.hbm_to_vmem [thread:$0]  (!%p1065_p0), %s1073_s12, 192, %s1075_s14, %s178_s15  }
  0x2f   : > { %p194_p12 = scmp.lt.s32.totalorder %s953_s22, 3  ;;  %p1242_p1 = scmp.ge.s32.totalorder %s953_s22, 1 }
  0x31   : > { %p195_p3 = pnand %p1242_p1, %p194_p12 }
  0x32   : > { %s1106_s11 = sand.u32 (!%p195_p3), 1, %s937_s18  }
  0x33   : > { %198 = sbr.rel (%p195_p3) target bundleno = 469 (0x1d5), region = 36  ;;  %s201_s16 = scalar_lea.sflag (!%p195_p3), [#allocation5], %s1106_s11 }
  0x34   : > { %s761_s13 = smul.u32 (!%p195_p3), 12, %s1106_s11 }
  0x36   : > { %s204_s3 = scalar_lea.vmem (!%p195_p3), [#allocation4], %s761_s13 }
  0x3a   : > { %924 = dma.done.wait (%p1044_p8), %s201_s16, 192  }
  0x3b   : > { %926 = vsyncadd (%p1044_p8), %s201_s16, 4294967104  ;;  %vm237_vm0 = vcmask 257024   ;;  %v231_v0 = vld [vmem:[%s204_s3 + $0x8] sm:$0xf]  ;;  %v230_v1 = vld [vmem:[%s204_s3] sm:$0xff]  ;;  %s956_s9 = smov 110   ;;  %v245_v8 = vlaneseq }
  0x3c   : > { %281 = vrot.lane.b32.xlu1 %v231_v0, %s956_s9  ;;  %s957_s12 = smov 127   ;;  %235 = vst [vmem:[#allocation2] sm:$0xf] %v230_v1  ;;  %v233_v2 = vcombine.high %v230_v1, %v230_v1  ;;  %238 = vst.msk [vmem:[#allocation2 + $0x10] sm:$0xf] %vm237_vm0, %v231_v0  ;;  %s958_s14 = smov 126  }
  0x3d   : > { %243 = vrot.lane.b32.xlu0 %v231_v0, %s957_s12  ;;  %s959_s28 = smov 108   ;;  %s960_s15 = smov 91   ;;  %v1118_v3 = vld [vmem:[%s1232_s1] sm:$0xff]  ;;  %vm411_vm1 = vcmask 293888   ;;  %v964_v4 = vmov 0.0   ;;  %v400_v6 = vld [vmem:[%s1233_s2 + $0x8] sm:$0xff] }
  0x3e   : > { %236 = vst [vmem:[#allocation2 + $0x8] sm:$0xf] %v233_v2  ;;  %s961_s23 = smov 109   ;;  %s962_s25 = smov 92   ;;  %492 = vmatprep.mubr.f32.mxu0 %v964_v4  ;;  %740 = vmatprep.mubr.msk.f32.mxu1 %vm411_vm1, %v1118_v3  ;;  %v399_v5 = vld [vmem:[%s1233_s2] sm:$0xff]  ;;  %v965_v7 = vmov 0  }
  0x3f   : > { %s963_s26 = smov 90   ;;  %838 = vset.pattern.permute.xlu0 %v965_v7  ;;  %839 = vset.pattern.permute.xlu1 %v965_v7  ;;  %v1129_v9 = vand.u32 127, %v245_v8  ;;  %vm262_vm4 = vcmask 261124   ;;  %vm418_vm11 = vcmask 1043456   ;;  %vm602_vm13 = vcmask 261120   ;;  %p1243_p9 = scmp.ne.s32.totalorder %s1239_s29, 0 }
  0x40   : > { %277 = vrot.lane.b32.xlu1 %v230_v1, %s956_s9  ;;  %s966_s6 = smov [#allocation7]  }
  0x41   : > { %239 = vrot.lane.b32.xlu0 %v230_v1, %s957_s12  ;;  %vm283_vm2 = vcmp.lt.s32.totalorder %v1129_v9, 110  ;;  %vm247_vm3 = vcmp.lt.s32.totalorder %v1129_v9, 127  ;;  %vm270_vm5 = vcmp.lt.s32.totalorder %v1129_v9, 126  ;;  %vm318_vm6 = vcmp.lt.s32.totalorder %v1129_v9, 108  ;;  %s875_s7 = sshll.u32 %s966_s6, 4  ;;  %s876_s7 = int_to_ptr.vmem [resolvable:$false] %s875_s7 }
  0x42   : > { %vm353_vm7 = vcmp.lt.s32.totalorder %v1129_v9, 91  ;;  %vm305_vm8 = vcmp.lt.s32.totalorder %v1129_v9, 109  ;;  %vm340_vm9 = vcmp.lt.s32.totalorder %v1129_v9, 92  ;;  %vm375_vm10 = vcmp.lt.s32.totalorder %v1129_v9, 90  ;;  %s877_s8 = scalar_lea.vmem %s876_s7, 1536 }
  0x44   : > { %279 = vrot.lane.b32.xlu1 %v233_v2, %s956_s9  ;;  %s580_s9 = sld [smem:[#allocation3]] }
  0x45   : > { %241 = vrot.lane.b32.xlu0 %v233_v2, %s957_s12  ;;  %s762_s12 = smul.u32 48, %s1106_s11 }
  0x48   : > { %268 = vrot.lane.b32.xlu1 %v231_v0, %s958_s14 }
  0x49   : > { %266 = vrot.lane.b32.xlu0 %v233_v2, %s958_s14 }
  0x4c   : > { %314 = vrot.lane.b32.xlu1 %v233_v2, %s959_s28 }
  0x4d   : > { %264 = vrot.lane.b32.xlu0 %v230_v1, %s958_s14  ;;  %s228_s14 = scalar_lea.vmem [#allocation7], %s762_s12 }
  0x50   : > { %349 = vrot.lane.b32.xlu1 %v233_v2, %s960_s15 }
  0x51   : > { %316 = vrot.lane.b32.xlu0 %v231_v0, %s959_s28 }
  0x54   : > { %312 = vrot.lane.b32.xlu1 %v230_v1, %s959_s28  ;;  %s623_s28 = sshll.u32 %s228_s14, 4  ;;  %s1175_s28 = int_to_ptr.vmem [resolvable:$true] %s623_s28 }
  0x55   : > { %351 = vrot.lane.b32.xlu0 %v231_v0, %s960_s15  ;;  %s871_s27 = scalar_lea.vmem %s1175_s28, 768  ;;  %p878_p5 = scmp.lt.s32.totalorder %s1175_s28, %s876_s7 }
  0x56   : > { %p872_p8 = scmp.ne.s32.totalorder %s1175_s28, %s871_s27  ;;  %p879_p13 = scmp.lt.s32.totalorder %s877_s8, %s871_s27 }
  0x58   : > { %301 = vrot.lane.b32.xlu1 %v233_v2, %s961_s23  ;;  %p873_p11 = pnand %p872_p8, %p1243_p9  ;;  %p880_p2 = por %p879_p13, %p878_p5 }
  0x59   : > { %347 = vrot.lane.b32.xlu0 %v230_v1, %s960_s15  ;;  %s763_s15 = smul.u32 768, %s945_s20 }
  0x5a   : > { %p874_p0 = pneg %p873_p11 }
  0x5c   : > { %336 = vrot.lane.b32.xlu1 %v233_v2, %s962_s25  ;;  %p881_p4 = pnand %p880_p2, %p874_p0 }
  0x5d   : > { %303 = vrot.lane.b32.xlu0 %v231_v0, %s961_s23 }
  0x60   : > { %299 = vrot.lane.b32.xlu1 %v230_v1, %s961_s23 }
  0x61   : > { %338 = vrot.lane.b32.xlu0 %v231_v0, %s962_s25 }
  0x64   : > { %371 = vrot.lane.b32.xlu1 %v233_v2, %s963_s26 }
  0x65   : > { %334 = vrot.lane.b32.xlu0 %v230_v1, %s962_s25  ;;  %s1182_s25 = scalar_lea.hbm %s1235_s4, %s763_s15 }
  0x68   : > { %369 = vrot.lane.b32.xlu1 %v230_v1, %s963_s26 }
  0x69   : > { %373 = vrot.lane.b32.xlu0 %v231_v0, %s963_s26  ;;  %s608_s26 = scalar_lea.sflag [#allocation6], %s1106_s11 }
  0x6c   : > { %408 = vperm.xlu1 %839, %v400_v6  }
  0x6d   : > { %403 = vperm.xlu0 %838, %v399_v5  }
  0xae   : > { %v282_v10 = vpop.permute.xlu1 %281 }
  0xaf   : > { %v244_v11 = vpop.permute.xlu0 %243 }
  0xb2   : > { %v278_v12 = vpop.permute.xlu1 %277 }
  0xb3   : > { %v240_v13 = vpop.permute.xlu0 %239  ;;  %v286_v14 = vsel %vm283_vm2, %v282_v10, %v278_v12 }
  0xb4   : > { %v250_v15 = vsel %vm247_vm3, %v244_v11, %v240_v13  ;;  %v292_v16 = vrot.slane %v286_v14, 4 }
  0xb5   : > { %v256_v17 = vrot.slane %v250_v15, 4 }
  0xb6   : > { %298 = vst.msk [vmem:[#allocation2 + $0x28] sm:$0xf0] %vm262_vm4, %v292_v16  ;;  %v280_v18 = vpop.permute.xlu1 %279 }
  0xb7   : > { %263 = vst.msk [vmem:[#allocation2 + $0x10] sm:$0xf0] %vm262_vm4, %v256_v17  ;;  %v242_v19 = vpop.permute.xlu0 %241  ;;  %v284_v20 = vsel %vm283_vm2, %v280_v18, %v282_v10  ;;  %v285_v21 = vsel %vm283_vm2, %v278_v12, %v280_v18 }
  0xb8   : > { %v248_v22 = vsel %vm247_vm3, %v242_v19, %v244_v11  ;;  %v249_v23 = vsel %vm247_vm3, %v240_v13, %v242_v19  ;;  %v290_v24 = vrot.slane %v285_v21, 4  ;;  %v291_v25 = vrot.slane %v284_v20, 4 }
  0xb9   : > { %v254_v26 = vrot.slane %v249_v23, 4  ;;  %v255_v27 = vrot.slane %v248_v22, 4 }
  0xba   : > { %296 = vst [vmem:[#allocation2 + $0x18] sm:$0xf0] %v290_v24  ;;  %297 = vst [vmem:[#allocation2 + $0x20] sm:$0xf0] %v291_v25  ;;  %v269_v28 = vpop.permute.xlu1 %268 }
  0xbb   : > { %260 = vst [vmem:[#allocation2] sm:$0xf0] %v254_v26  ;;  %261 = vst [vmem:[#allocation2 + $0x8] sm:$0xf0] %v255_v27  ;;  %v267_v29 = vpop.permute.xlu0 %266 }
  0xbc   : > { %v271_v30 = vsel %vm270_vm5, %v267_v29, %v269_v28 }
  0xbd   : > { %275 = vst [vmem:[#allocation2 + $0x20] sm:$0xf] %v271_v30 }
  0xbe   : > { %v315_v31 = vpop.permute.xlu1 %314  ;;  %v386_v47 = vld [vmem:[#allocation2 + $0x10] sm:$0xff] }
  0xbf   : > { %v265_v32 = vpop.permute.xlu0 %264 }
  0xc0   : > { %v272_v33 = vsel %vm270_vm5, %v265_v32, %v267_v29  ;;  %v273_v34 = vsel %vm270_vm5, %v269_v28, %v265_v32  ;;  %v383_v29 = vld [vmem:[%s1232_s1 + $0x8] sm:$0xff] }
  0xc1   : > { %274 = vst [vmem:[#allocation2 + $0x18] sm:$0xf] %v272_v33  ;;  %276 = vst.msk [vmem:[#allocation2 + $0x28] sm:$0xf] %vm237_vm0, %v273_v34  ;;  %v587_v33 = vstv %s580_s9 }
  0xc2   : > { %v350_v35 = vpop.permute.xlu1 %349  ;;  %v385_v38 = vld [vmem:[#allocation2 + $0x8] sm:$0xff]  ;;  %v384_v54 = vld [vmem:[#allocation2] sm:$0xff] }
  0xc3   : > { %v317_v36 = vpop.permute.xlu0 %316 }
  0xc4   : > { %v319_v37 = vsel %vm318_vm6, %v315_v31, %v317_v36  ;;  %v388_v39 = vld [vmem:[#allocation2 + $0x20] sm:$0xff] }
  0xc5   : > { %v326_v40 = vrot.slane %v319_v37, 4  ;;  %v743_v41 = vpack.c.bf16 %v388_v39, %v385_v38 }
  0xc6   : > { %v313_v42 = vpop.permute.xlu1 %312 }
  0xc7   : > { %332 = vst [vmem:[#allocation2 + $0x38] sm:$0xf0] %v326_v40  ;;  %v352_v43 = vpop.permute.xlu0 %351  ;;  %744 = vmatprep.subr.bf16.mxu0 %v743_v41  ;;  %v320_v44 = vsel %vm318_vm6, %v313_v42, %v315_v31  ;;  %v321_v45 = vsel %vm318_vm6, %v317_v36, %v313_v42 }
  0xc8   : > { %v354_v46 = vsel %vm353_vm7, %v350_v35, %v352_v43  ;;  %v389_v48 = vld [vmem:[#allocation2 + $0x28] sm:$0xff]  ;;  %v387_v49 = vld [vmem:[#allocation2 + $0x18] sm:$0xff]  ;;  %v325_v50 = vrot.slane %v320_v44, 4  ;;  %v327_v51 = vrot.slane %v321_v45, 4 }
  0xc9   : > { %v361_v52 = vrot.slane %v354_v46, 4  ;;  %v751_v53 = vpack.c.bf16 %v389_v48, %v386_v47  ;;  %v745_v55 = vpack.c.bf16 %v387_v49, %v384_v54 }
  0xca   : > { %331 = vst [vmem:[#allocation2 + $0x30] sm:$0xf0] %v325_v50  ;;  %333 = vst.msk [vmem:[#allocation2 + $0x40] sm:$0xf0] %vm262_vm4, %v327_v51  ;;  %v302_v56 = vpop.permute.xlu1 %301 }
  0xcb   : > { %367 = vst [vmem:[#allocation2 + $0x50] sm:$0xf0] %v361_v52  ;;  %752 = vmatprep.subr.bf16.mxu1 %v751_v53  ;;  %v348_v57 = vpop.permute.xlu0 %347  ;;  %746 = vmatpush1.bf16.msra.mxu0 %v745_v55 }
  0xcc   : > { %v355_v58 = vsel %vm353_vm7, %v348_v57, %v350_v35  ;;  %v356_v59 = vsel %vm353_vm7, %v352_v43, %v348_v57  ;;  %754 = vmatpush3.bf16.msra.mxu1 %v751_v53 }
  0xcd   : > { %v360_v60 = vrot.slane %v355_v58, 4  ;;  %v362_v61 = vrot.slane %v356_v59, 4 }
  0xce   : > { %v337_v62 = vpop.permute.xlu1 %336 }
  0xcf   : > { %366 = vst [vmem:[#allocation2 + $0x48] sm:$0xf0] %v360_v60  ;;  %368 = vst.msk [vmem:[#allocation2 + $0x58] sm:$0xf0] %vm262_vm4, %v362_v61  ;;  %v304_v63 = vpop.permute.xlu0 %303 }
  0xd0   : > { %v306_v0 = vsel %vm305_vm8, %v302_v56, %v304_v63 }
  0xd1   : > { %310 = vst [vmem:[#allocation2 + $0x38] sm:$0xf] %v306_v0 }
  0xd2   : > { %v300_v1 = vpop.permute.xlu1 %299 }
  0xd3   : > { %v339_v2 = vpop.permute.xlu0 %338  ;;  %v307_v5 = vsel %vm305_vm8, %v300_v1, %v302_v56  ;;  %v308_v6 = vsel %vm305_vm8, %v304_v63, %v300_v1 }
  0xd4   : > { %v341_v7 = vsel %vm340_vm9, %v337_v62, %v339_v2  ;;  %309 = vst [vmem:[#allocation2 + $0x30] sm:$0xf] %v307_v5  ;;  %311 = vst.msk [vmem:[#allocation2 + $0x40] sm:$0xf] %vm237_vm0, %v308_v6 }
  0xd5   : > { %345 = vst [vmem:[#allocation2 + $0x50] sm:$0xf] %v341_v7 }
  0xd6   : > { %v372_v8 = vpop.permute.xlu1 %371 }
  0xd7   : > { %v335_v10 = vpop.permute.xlu0 %334 }
  0xd8   : > { %v342_v11 = vsel %vm340_vm9, %v335_v10, %v337_v62  ;;  %v343_v12 = vsel %vm340_vm9, %v339_v2, %v335_v10  ;;  %v391_v18 = vld [vmem:[#allocation2 + $0x38] sm:$0xff] }
  0xd9   : > { %344 = vst [vmem:[#allocation2 + $0x48] sm:$0xf] %v342_v11  ;;  %346 = vst.msk [vmem:[#allocation2 + $0x58] sm:$0xf] %vm237_vm0, %v343_v12 }
  0xda   : > { %v370_v13 = vpop.permute.xlu1 %369 }
  0xdb   : > { %v374_v14 = vpop.permute.xlu0 %373  ;;  %v377_v15 = vsel %vm375_vm10, %v370_v13, %v372_v8  ;;  %v390_v21 = vld [vmem:[#allocation2 + $0x30] sm:$0xff]  ;;  %v392_v23 = vld [vmem:[#allocation2 + $0x40] sm:$0xff] }
  0xdc   : > { %v376_v16 = vsel %vm375_vm10, %v372_v8, %v374_v14  ;;  %v378_v17 = vsel %vm375_vm10, %v374_v14, %v370_v13  ;;  %v394_v19 = vld [vmem:[#allocation2 + $0x50] sm:$0xff]  ;;  %379 = vst [vmem:[#allocation2 + $0x60] sm:$0xf] %v377_v15 }
  0xdd   : > { %380 = vst [vmem:[#allocation2 + $0x68] sm:$0xf] %v376_v16  ;;  %381 = vst.msk [vmem:[#allocation2 + $0x70] sm:$0xf] %vm237_vm0, %v378_v17  ;;  %v747_v20 = vpack.c.bf16 %v394_v19, %v391_v18 }
  0xdf   : > { %748 = vmatprep.subr.bf16.mxu0 %v747_v20 }
  0xe0   : > { %v393_v22 = vld [vmem:[#allocation2 + $0x48] sm:$0xff]  ;;  %v395_v24 = vld [vmem:[#allocation2 + $0x58] sm:$0xff] }
  0xe1   : > { %v749_v25 = vpack.c.bf16 %v393_v22, %v390_v21  ;;  %v755_v26 = vpack.c.bf16 %v395_v24, %v392_v23 }
  0xe3   : > { %750 = vmatpush1.bf16.msra.mxu0 %v749_v25  ;;  %756 = vmatprep.subr.bf16.mxu1 %v755_v26  ;;  %v396_v28 = vld [vmem:[#allocation2 + $0x60] sm:$0xf] }
  0xe4   : > { %758 = vmatpush3.bf16.msra.mxu1 %v755_v26  ;;  %v397_v9 = vld [vmem:[#allocation2 + $0x68] sm:$0xf]  ;;  %v398_v27 = vld [vmem:[#allocation2 + $0x70] sm:$0xf] }
  0xe5   : > { %713 = vmatprep.subr.msk.mxu0 %vm418_vm11, %v397_v9  ;;  %738 = vmatprep.subr.msk.mxu1 %vm418_vm11, %v398_v27 }
  0xe7   : > { %714 = vmatpush1.msk.msra.mxu0 %vm418_vm11, %v396_v28 }
  0xe8   : > { %715 = vmatmul.mubr.msk.f32.vlgmr.msra.gmra.mrb[0].mxu0 %vm411_vm1, %v1118_v3  ;;  %739 = vmatpush3.msk.msra.mxu1 %vm418_vm11, %v398_v27 }
  0xe9   : > { %741 = vmatmul.mubr.msk.f32.vlgmr.msra.gmra.mrb[0].mxu1 %vm411_vm1, %v383_v29  ;;  %498 = vmatprep.mubr.f32.mxu0 %v964_v4 }
  0xeb   : > { %v409_v31 = vpop.permute.xlu1 %408 }
  0xec   : > { %716 = vmatmul.mubr.msk.f32.gmra.mrb[2].mxu0 %vm411_vm1, %v383_v29  ;;  %v404_v30 = vpop.permute.xlu0 %403 }
 0x1bb   : > { %v494_v32 = vpop.f32.mrb[0].mxu0 }
 0x1bc   : > { %v495_v34 = vadd.f32 %v494_v32, %v404_v30  ;;  %v496_v35 = vpop.f32.mrb[1].mxu0  ;;  %v742_v36 = vpop.f32.mrb[0].mxu1 }
 0x1bd   : > { %v497_v37 = vadd.f32 %v496_v35, %v404_v30  ;;  %v577_v38 = vadd.f32 %v742_v36, %v409_v31  ;;  %v571_v39 = vpop.f32.mrb[1].mxu1 }
 0x1be   : > { %vm581_vm12 = vcmp.ge.f32.partialorder %v495_v34, 0.0  ;;  %v588_v3 = vmul.f32 %v587_v33, %v495_v34  ;;  %v572_v40 = vadd.f32 %v571_v39, %v404_v30 }
 0x1bf   : > { %vm582_vm14 = vcmp.ge.f32.partialorder %v497_v37, 0.0  ;;  %v589_v4 = vmul.f32 %v587_v33, %v497_v37  ;;  %vm586_vm15 = vcmp.ge.f32.partialorder %v577_v38, 0.0  ;;  %v593_v41 = vmul.f32 %v587_v33, %v577_v38  ;;  %v500_v42 = vpop.f32.mrb[2].mxu0 }
 0x1c0   : > { %v594_v43 = vsel %vm581_vm12, %v495_v34, %v588_v3  ;;  %vm583_vm0 = vcmp.ge.f32.partialorder %v572_v40, 0.0  ;;  %v590_v44 = vmul.f32 %v587_v33, %v572_v40  ;;  %v501_v45 = vadd.f32 %v500_v42, %v409_v31  ;;  %v502_v46 = vpop.f32.mrb[3].mxu0 }
 0x1c1   : > { %600 = vst [vmem:[%s228_s14] sm:$0xff] %v594_v43  ;;  %v595_v47 = vsel %vm582_vm14, %v497_v37, %v589_v4  ;;  %v599_v48 = vsel %vm586_vm15, %v577_v38, %v593_v41  ;;  %v503_v49 = vadd.f32 %v502_v46, %v409_v31 }
 0x1c2   : > { %601 = vst [vmem:[%s228_s14 + $0x8] sm:$0xff] %v595_v47  ;;  %606 = vst.msk [vmem:[%s228_s14 + $0x28] sm:$0xff] %vm602_vm13, %v599_v48  ;;  %v596_v50 = vsel %vm583_vm0, %v572_v40, %v590_v44  ;;  %vm584_vm1 = vcmp.ge.f32.partialorder %v501_v45, 0.0  ;;  %v591_v51 = vmul.f32 %v587_v33, %v501_v45 }
 0x1c3   : > { %603 = vst.msk [vmem:[%s228_s14 + $0x10] sm:$0xff] %vm602_vm13, %v596_v50  ;;  %vm585_vm2 = vcmp.ge.f32.partialorder %v503_v49, 0.0  ;;  %v592_v52 = vmul.f32 %v587_v33, %v503_v49 }
 0x1c4   : > { %v597_v53 = vsel %vm584_vm1, %v501_v45, %v591_v51 }
 0x1c5   : > { %604 = vst [vmem:[%s228_s14 + $0x18] sm:$0xff] %v597_v53  ;;  %v598_v54 = vsel %vm585_vm2, %v503_v49, %v592_v52 }
 0x1c6   : > { %605 = vst [vmem:[%s228_s14 + $0x20] sm:$0xff] %v598_v54 }
 0x1c7   : > { %884 = shalt.err (!%p881_p4)
}
 0x1c8   : > { %s885_s10 = scalar_lea.hbm %s1182_s25, 768  ;;  %s889_s3 = scalar_lea.hbm %s1235_s4, 1536 }
 0x1c9   : > { %p886_p6 = scmp.ne.s32.totalorder %s1182_s25, %s885_s10  ;;  %p890_p12 = scmp.lt.u32.totalorder %s1182_s25, %s1235_s4 }
 0x1ca   : > { %p891_p1 = scmp.lt.u32.totalorder %s889_s3, %s885_s10  ;;  %p893_p8 = scmp.lt.u32.totalorder %s885_s10, %s1182_s25 }
 0x1cb   : > { %p887_p7 = pnand %p886_p6, %p1243_p9 }
 0x1cc   : > { %p892_p3 = por %p891_p1, %p890_p12 }
 0x1cd   : > { %p888_p10 = pneg %p887_p7 }
 0x1ce   : > { %p894_p11 = por %p893_p8, %p892_p3 }
 0x1d0   : > { %p895_p0 = pnand %p894_p11, %p888_p10 }
 0x1d2   : > { %898 = shalt.err (!%p895_p0)
}
 0x1d3   : > { %s967_s14 = smov 384   ;;  %s968_s15 = smov 24  }
 0x1d4   : > { %766 = dma.vmem_to_hbm [thread:$0]  (%p1243_p9), %s1175_s28, 768, %s1182_s25, %s608_s26, %s967_s14, %s967_s14, %s968_s15  }
 0x1d5 PF: > { %s638_s20 = sand.u32 1, %s933_s17   ;;  %p1244_p5 = scmp.ne.s32.totalorder %s1240_s5, 0 }
 0x1d6   : > { %p1245_p13 = scmp.ge.s32.totalorder %s953_s22, 2  ;;  %s639_s23 = scalar_lea.sflag [#allocation6], %s638_s20 }
 0x1d8   : > { %p773_p2 = pnand %p1245_p13, %p1244_p5 }
 0x1da   : > { %928 = dma.done.wait (!%p773_p2), %s639_s23, 768  }
 0x1db   : > { %930 = vsyncadd (!%p773_p2), %s639_s23, 4294966528  ;;  %s21_s22 = sadd.s32 1, %s953_s22   ;;  %s1246_s17 = smov %s937_s18 }
 0x1dc   : > { %p18_p4 = scmp.ge.s32.totalorder %s21_s22, 4   ;;  %s1247_s18 = smov %s941_s19 }
 0x1dd   : > { %s1248_s19 = smov %s1053_s30  ;;  %s1249_s20 = smov %s949_s21 }
 0x1de   : > { %s1250_s21 = smov %s1252_s24  ;;  %20 = sbr.rel (!%p18_p4) target bundleno = 8 (0x8), region = 81 }
 0x1e5   :  { %644 = vsyncpa [#allocation5], 1 }
 0x1e6   :  { %646 = vsyncpa [#allocation5 + $0x1], 1 }
 0x1e7   :  { %647 = vsyncpa [#allocation6], 1 }
 0x1e8   :  { %649 = vsyncpa [#allocation6 + $0x1], 1 }

</bundles_post_ra>
